<compile_context>
chip_gen: v7x
topology: tpu7x:2x2x1
jax: 0.10.0
libtpu: 0.0.40
codegen_flags: <defaults>
</compile_context>

<pallas_src>
import functools

import jax
import jax.numpy as jnp
from jax.experimental import pallas as pl
from jax.experimental.pallas import tpu as pltpu


def _ib_focal_kernel(logits_ref, target_ref, feat_ref, loss_ref, *,
                     alpha, epsilon, gamma, n_rows, block_rows):
    pid = pl.program_id(0)

    x = logits_ref[...].astype(jnp.float32)      # (TM, C)  cast in-kernel
    t = target_ref[...]                          # (TM, 1)  int32
    f = feat_ref[...].astype(jnp.float32)        # (TM, 1)

    # Column of ones: row-sum reductions run on the otherwise-idle MXU instead
    # of the XLU; only the row-max stays on the XLU.
    ones_col = jnp.ones((x.shape[1], 1), dtype=jnp.float32)
    iota = jax.lax.broadcasted_iota(jnp.int32, x.shape, 1)   # TPU needs >=2D iota

    # Row-wise stable logsumexp + target logit: only p_t is needed.
    m = jnp.max(x, axis=-1, keepdims=True)                       # (TM, 1)  XLU
    exp_z = jnp.exp(x - m)                                       # (TM, C)  EUP/VPU
    s = jnp.dot(exp_z, ones_col,                                 # (TM, 1)  MXU
                preferred_element_type=jnp.float32,
                precision=jax.lax.Precision.HIGHEST)
    # Target logit without materializing a one-hot: select, then MXU row-sum.
    x_t = jnp.dot(jnp.where(iota == t, x, 0.0), ones_col,        # (TM, 1)  MXU
                  preferred_element_type=jnp.float32,
                  precision=jax.lax.Precision.HIGHEST)

    logp_t = (x_t - m) - jnp.log(s)
    ce = -logp_t                                  # F.cross_entropy(..., 'none')
    p_t = jnp.exp(logp_t)                         # == exp(-ce)

    # grads = sum(|softmax - onehot|, 1) == 2*(1 - p_t) for in-range targets.
    grads = 2.0 * (1.0 - p_t)
    ib = alpha / (grads * f + epsilon)

    # Focal factor, specialized on compile-time gamma (default 0.0 -> free).
    # TODO(synk): per-class `weight` vector (module default is None) not wired in.
    if gamma == 0.0:
        loss_rows = ce * ib
    elif gamma == 1.0:
        loss_rows = jnp.maximum(1.0 - p_t, 0.0) * ce * ib
    else:
        # clamp avoids NaN from pow(tiny negative, fractional gamma)
        loss_rows = (jnp.maximum(1.0 - p_t, 0.0) ** gamma) * ce * ib

    # Zero padded rows of a ragged last tile (their stores are also masked by
    # Pallas, but keep garbage out of the math explicitly).
    row = jax.lax.broadcasted_iota(jnp.int32, loss_rows.shape, 0) + pid * block_rows
    loss_rows = jnp.where(row < n_rows, loss_rows, 0.0)

    loss_ref[...] = loss_rows


def ib_focal_loss_pallas(logits, target, features, *,
                         alpha=10000.0, gamma=0.0, epsilon=0.001,
                         row_cap=4096, logits_buf_bytes=2 * 1024 * 1024):
    """logits: [N, C] float (any dtype), target: [N] int, features: [N] or [N,1]."""
    n, c = logits.shape
    target2d = target.reshape(n, 1).astype(jnp.int32)
    feat2d = features.reshape(n, 1).astype(jnp.float32)

    itemsize = jnp.dtype(logits.dtype).itemsize
    # Sublane packing granularity for the streamed dtype (f32: 8, bf16: 16, i8: 32).
    row_align = 8 * max(1, 4 // itemsize)

    # Size the row tile from a byte target (~2 MiB per logits buffer, double
    # buffered by the pipeline) so the ~0.35us per-grid-step overhead is
    # amortized, with a row cap so tiny-C problems keep reasonable tiles.
    # TODO(synk): tile the class axis with an online logsumexp for vocab-scale C
    #             (for huge C the row_align floor alone can exceed the budget).
    rows_by_bytes = max(row_align, int(logits_buf_bytes) // max(1, c * itemsize))
    tm = min(int(row_cap), int(rows_by_bytes))
    tm = max(row_align, (tm // row_align) * row_align)
    if tm >= n:
        tm = n                      # single tile; block dim == full array dim is allowed
    num_tiles = pl.cdiv(n, tm)

    # Scoped-VMEM budget: double-buffered native-dtype logits stream plus a
    # handful of (TM, C) f32 temporaries. 32 MiB floor is safe on all of
    # v5e / v6e (128 MiB physical) and v7x (64 MiB physical).
    logits_tile_bytes = tm * c * itemsize
    tile_f32_bytes = tm * c * 4
    vmem_limit = int(min(100 * 1024 * 1024,
                         max(32 * 1024 * 1024,
                             2 * logits_tile_bytes + 6 * tile_f32_bytes)))

    # Note: C is streamed at its native width; padding C to a multiple of 128 in
    # the wrapper would cost an extra full HBM pass over the dominant array, so
    # it is intentionally not done for this memory-bound kernel.

    kernel = functools.partial(_ib_focal_kernel,
                               alpha=float(alpha),
                               epsilon=float(epsilon),
                               gamma=float(gamma),
                               n_rows=int(n),
                               block_rows=int(tm))

    per_row = pl.pallas_call(
        kernel,
        out_shape=jax.ShapeDtypeStruct((n, 1), jnp.float32),
        grid_spec=pltpu.PrefetchScalarGridSpec(
            num_scalar_prefetch=0,
            grid=(num_tiles,),
            in_specs=[
                pl.BlockSpec((tm, c), lambda i: (i, 0)),   # logits, native dtype
                pl.BlockSpec((tm, 1), lambda i: (i, 0)),   # target
                pl.BlockSpec((tm, 1), lambda i: (i, 0)),   # features
            ],
            out_specs=pl.BlockSpec((tm, 1), lambda i: (i, 0)),
        ),
        compiler_params=pltpu.CompilerParams(
            dimension_semantics=("parallel",),     # no cross-step state -> megacore-shardable
            vmem_limit_bytes=vmem_limit),
    )(logits, target2d, feat2d)

    # Final mean as an accurate tree-sum outside the kernel (tiny: N floats).
    return jnp.sum(per_row) / float(n)


def ib_focal_loss_ref(logits, target, features, *,
                      alpha=10000.0, gamma=0.0, epsilon=0.001):
    """Pure-JAX reference mirroring the PyTorch module."""
    n, c = logits.shape
    p = jax.nn.softmax(logits, axis=1)
    onehot = jax.nn.one_hot(target, c, dtype=logits.dtype)
    grads = jnp.sum(jnp.abs(p - onehot), axis=1)
    ib = grads * features.reshape(-1)
    ib = alpha / (ib + epsilon)
    logp = jax.nn.log_softmax(logits, axis=1)
    ce = -jnp.take_along_axis(logp, target[:, None], axis=1)[:, 0]
    pe = jnp.exp(-ce)
    return jnp.mean(((1.0 - pe) ** gamma) * ce * ib)


if __name__ == "__main__":
    key = jax.random.PRNGKey(0)

    # Case 1: tiny single-tile case (N=8, C=16), default gamma=0.
    k1, k2, k3 = jax.random.split(key, 3)
    N, C = 8, 16
    logits = jax.random.normal(k1, (N, C), dtype=jnp.float32)
    target = jax.random.randint(k2, (N,), 0, C, dtype=jnp.int32)
    features = jax.nn.relu(jax.random.normal(k3, (N,), dtype=jnp.float32)) + 0.1

    loss = ib_focal_loss_pallas(logits, target, features,
                                alpha=10000.0, gamma=0.0)
    jax.block_until_ready(loss)
    ref = ib_focal_loss_ref(logits, target, features, alpha=10000.0, gamma=0.0)
    assert jnp.allclose(loss, ref, rtol=1e-4, atol=1e-2), (loss, ref)

    # Case 2: multi-tile with a ragged last tile (N=40, C=128, TM=16), gamma=2.
    k4, k5, k6 = jax.random.split(jax.random.PRNGKey(0), 3)
    N2, C2 = 40, 128
    logits2 = jax.random.normal(k4, (N2, C2), dtype=jnp.float32)
    target2 = jax.random.randint(k5, (N2,), 0, C2, dtype=jnp.int32)
    features2 = jax.nn.relu(jax.random.normal(k6, (N2,), dtype=jnp.float32)) + 0.1

    loss2 = ib_focal_loss_pallas(logits2, target2, features2,
                                 alpha=10000.0, gamma=2.0, row_cap=16)
    jax.block_until_ready(loss2)
    ref2 = ib_focal_loss_ref(logits2, target2, features2,
                             alpha=10000.0, gamma=2.0)
    assert jnp.allclose(loss2, ref2, rtol=1e-4, atol=1e-2), (loss2, ref2)

    print("KERNEL_OK")
</pallas_src>

<mosaic_0001>
module attributes {stable_mosaic.version = 11 : i64} {
  func.func @_ib_focal_kernel(%arg0: i32, %arg1: memref<8x16xf32, #tpu.memory_space<vmem>>, %arg2: memref<8x1xi32, #tpu.memory_space<vmem>>, %arg3: memref<8x1xf32, #tpu.memory_space<vmem>>, %arg4: memref<8x1xf32, #tpu.memory_space<vmem>>) attributes {dimension_semantics = [#tpu.dimension_semantics<parallel>], iteration_bounds = array<i64: 1>, scalar_prefetch = 0 : i64, scratch_operands = 0 : i64, tpu.core_type = #tpu.core_type<tc>, window_params = [{transform_indices = @transform_0, window_bounds = array<i64: 8, 16>}, {transform_indices = @transform_1, window_bounds = array<i64: 8, 1>}, {transform_indices = @transform_2, window_bounds = array<i64: 8, 1>}, {transform_indices = @transform_3, window_bounds = array<i64: 8, 1>}]} {
    %c0 = arith.constant 0 : index
    %c0_0 = arith.constant 0 : index
    %0 = vector.load %arg1[%c0, %c0_0] : memref<8x16xf32, #tpu.memory_space<vmem>>, vector<8x16xf32>
    %c0_1 = arith.constant 0 : index
    %c0_2 = arith.constant 0 : index
    %1 = vector.load %arg2[%c0_1, %c0_2] : memref<8x1xi32, #tpu.memory_space<vmem>>, vector<8x1xi32>
    %c0_3 = arith.constant 0 : index
    %c0_4 = arith.constant 0 : index
    %2 = vector.load %arg3[%c0_3, %c0_4] : memref<8x1xf32, #tpu.memory_space<vmem>>, vector<8x1xf32>
    %cst = arith.constant 1.000000e+00 : f32
    %3 = vector.broadcast %cst : f32 to vector<16x1xf32>
    %4 = tpu.iota {dimensions = array<i32: 1>} : vector<8x16xi32>
    %cst_5 = arith.constant dense<0xFF800000> : vector<8xf32>
    %5 = vector.multi_reduction <maximumf>, %0, %cst_5 [1] : vector<8x16xf32> to vector<8xf32>
    %6 = vector.shape_cast %5 : vector<8xf32> to vector<8x1xf32>
    %7 = vector.broadcast %6 : vector<8x1xf32> to vector<8x16xf32>
    %8 = arith.subf %0, %7 : vector<8x16xf32>
    %9 = math.exp %8 : vector<8x16xf32>
    %cst_6 = arith.constant dense<0.000000e+00> : vector<8x1xf32>
    %10 = tpu.matmul %9, %3, %cst_6 {dimension_numbers = #tpu.dot_dimension_numbers<[1], [0], [0], [1], [0, 0, 1, 1], [], []>, precision = #tpu.contract_precision<fp32>} : vector<8x16xf32>, vector<16x1xf32>, vector<8x1xf32> -> vector<8x1xf32>
    %11 = vector.broadcast %1 : vector<8x1xi32> to vector<8x16xi32>
    %12 = arith.cmpi eq, %4, %11 : vector<8x16xi32>
    %cst_7 = arith.constant 0.000000e+00 : f32
    %13 = vector.broadcast %cst_7 : f32 to vector<8x16xf32>
    %14 = arith.select %12, %0, %13 : vector<8x16xi1>, vector<8x16xf32>
    %cst_8 = arith.constant dense<0.000000e+00> : vector<8x1xf32>
    %15 = tpu.matmul %14, %3, %cst_8 {dimension_numbers = #tpu.dot_dimension_numbers<[1], [0], [0], [1], [0, 0, 1, 1], [], []>, precision = #tpu.contract_precision<fp32>} : vector<8x16xf32>, vector<16x1xf32>, vector<8x1xf32> -> vector<8x1xf32>
    %16 = arith.subf %15, %6 : vector<8x1xf32>
    %17 = math.log %10 : vector<8x1xf32>
    %18 = arith.subf %16, %17 : vector<8x1xf32>
    %cst_9 = arith.constant 0.000000e+00 : f32
    %19 = vector.broadcast %cst_9 : f32 to vector<8x1xf32>
    %20 = arith.subf %19, %18 : vector<8x1xf32>
    %21 = math.exp %18 : vector<8x1xf32>
    %cst_10 = arith.constant 1.000000e+00 : f32
    %22 = vector.broadcast %cst_10 : f32 to vector<8x1xf32>
    %23 = arith.subf %22, %21 : vector<8x1xf32>
    %cst_11 = arith.constant 2.000000e+00 : f32
    %24 = vector.broadcast %cst_11 : f32 to vector<8x1xf32>
    %25 = arith.mulf %24, %23 : vector<8x1xf32>
    %26 = arith.mulf %25, %2 : vector<8x1xf32>
    %cst_12 = arith.constant 1.000000e-03 : f32
    %27 = vector.broadcast %cst_12 : f32 to vector<8x1xf32>
    %28 = arith.addf %26, %27 : vector<8x1xf32>
    %cst_13 = arith.constant 1.000000e+04 : f32
    %29 = vector.broadcast %cst_13 : f32 to vector<8x1xf32>
    %30 = arith.divf %29, %28 : vector<8x1xf32>
    %31 = arith.mulf %20, %30 : vector<8x1xf32>
    %32 = tpu.iota {dimensions = array<i32: 0>} : vector<8x1xi32>
    %c8_i32 = arith.constant 8 : i32
    %33 = arith.muli %arg0, %c8_i32 : i32
    %34 = vector.broadcast %33 : i32 to vector<8x1xi32>
    %35 = arith.addi %32, %34 : vector<8x1xi32>
    %c8_i32_14 = arith.constant 8 : i32
    %36 = vector.broadcast %c8_i32_14 : i32 to vector<8x1xi32>
    %37 = arith.cmpi slt, %35, %36 : vector<8x1xi32>
    %cst_15 = arith.constant 0.000000e+00 : f32
    %38 = vector.broadcast %cst_15 : f32 to vector<8x1xf32>
    %39 = arith.select %37, %31, %38 : vector<8x1xi1>, vector<8x1xf32>
    %c0_16 = arith.constant 0 : index
    %c0_17 = arith.constant 0 : index
    %40 = vector.load %arg4[%c0_16, %c0_17] : memref<8x1xf32, #tpu.memory_space<vmem>>, vector<8x1xf32>
    tpu.vector_store %arg4[%c0_16, %c0_17], %39 {strides = array<i32>} : memref<8x1xf32, #tpu.memory_space<vmem>>, vector<8x1xf32>,
    return
  }
  func.func @transform_0(%arg0: i32) -> (i32, i32) {
    %c0_i32 = arith.constant 0 : i32
    %c0_i32_0 = arith.constant 0 : i32
    return %arg0, %c0_i32 : i32, i32
  }
  func.func @transform_1(%arg0: i32) -> (i32, i32) {
    %c0_i32 = arith.constant 0 : i32
    %c0_i32_0 = arith.constant 0 : i32
    return %arg0, %c0_i32 : i32, i32
  }
  func.func @transform_2(%arg0: i32) -> (i32, i32) {
    %c0_i32 = arith.constant 0 : i32
    %c0_i32_0 = arith.constant 0 : i32
    return %arg0, %c0_i32 : i32, i32
  }
  func.func @transform_3(%arg0: i32) -> (i32, i32) {
    %c0_i32 = arith.constant 0 : i32
    %c0_i32_0 = arith.constant 0 : i32
    return %arg0, %c0_i32 : i32, i32
  }
}

</mosaic_0001>

<bundles_post_ra>
// kernel: tpu_custom_call.1
= control target key start
LH: loop header
LB: loop body
LE: loop exit
PB: predicated region body
PF: predicated region fallthrough
CT: control target
= control target key end

     0   :  { %vm19_vm0 = vcmask 130048   ;;  %v1078_v1 = vmov 0   ;;  %v1079_v4 = vmov 0.0|0.0   ;;  %vm1080_vm1 = vmmov 0   ;;  %s1170_s0 = inlined_call_operand.vmem [shape: f32[8,16], index: 0, kind: input, shape index: {}]   ;;  %s1171_s1 = inlined_call_operand.vmem [shape: s32[8,1], index: 1, kind: input, shape index: {}]   ;;  %s1172_s2 = inlined_call_operand.vmem [shape: f32[8,1], index: 2, kind: input, shape index: {}]   ;;  %s1173_s3 = inlined_call_operand.vmem [shape: f32[8,1], index: 3, kind: output, shape index: {}]  }
   0x1   :  { %v14_v0 = vld [vmem:[%s1170_s0] sm:$0xff]  ;;  %1069 = vset.pattern.permute.xlu0 %v1078_v1  ;;  %1038 = vmatprep.subr.bf16.mxu1 %v1079_v4  ;;  %v1081_v5 = vmov 0.0   ;;  %v1082_v6 = vmov 1.0|1.0   ;;  %v17_v9 = vlaneseq  ;;  %vm924_vm3 = vcmask 7168  }
   0x2   :  { %v20_v2 = vsel %vm19_vm0, %v14_v0, -inf  ;;  %v15_v3 = vld [vmem:[%s1171_s1] sm:$0xff]  ;;  %1000 = vmatprep.mubr.msk.f32.mxu1 %vm1080_vm1, %v1081_v5  ;;  %1039 = vmatpush3.bf16.msra.mxu1 %v1082_v6 }
   0x3   :  { %21 = vmax.xlane.f32.xlu0 %v20_v2  ;;  %1032 = vmatprep.subr.bf16.mxu0 %v1079_v4  ;;  %v18_v11 = vand.u32 127, %v17_v9  ;;  %v16_v38 = vld [vmem:[%s1172_s2] sm:$0xff] }
   0x4   :  { %1033 = vmatpush3.bf16.msra.mxu0 %v1082_v6  ;;  %964 = vmatprep.mubr.msk.f32.mxu0 %vm1080_vm1, %v1081_v5 }
   0x5   :  { %967 = vmatprep.subr.mxu0 %v1081_v5  ;;  %1003 = vmatprep.subr.mxu1 %v1081_v5 }
  0x19   :  { %463 = vperm.xlu0 %1069, %v15_v3  }
  0x90   :  { %v1120_v7 = vpop.xlane.xlu0 %21 }
  0x91   :  { %v23_v8 = vsub.f32 %v14_v0, %v1120_v7 }
  0x93   :  { %v24_v10 = vmul.f32 1.442695, %v23_v8 }
  0x95   :  { %1070 = vpow2.f32 %v24_v10 }
  0x98   :  { %v464_v12 = vpop.permute.xlu0 %463 }
  0x99   :  { %vm465_vm2 = vcmp.eq.s32.totalorder %v18_v11, %v464_v12 }
  0x9a   :  { %v466_v13 = vsel %vm465_vm2, %v14_v0, 0.0 }
  0x9b   :  { %v468_v14 = vsel %vm19_vm0, %v466_v13, 0 }
  0x9c   :  { %v535_v15 = vand.u32 4294901760, %v468_v14 }
  0x9e   :  { %v536_v16 = vsub.f32 %v468_v14, %v535_v15 }
  0x9f   :  { %v1071_v17 = vpop.eup %1070 }
  0xa0   :  { %v537_v18 = vand.u32 4294901760, %v536_v16  ;;  %v27_v19 = vsel %vm19_vm0, %v1071_v17, 0 }
  0xa1   :  { %v94_v20 = vand.u32 4294901760, %v27_v19 }
  0xa2   :  { %v538_v21 = vsub.f32 %v536_v16, %v537_v18 }
  0xa3   :  { %v95_v22 = vsub.f32 %v27_v19, %v94_v20 }
  0xa4   :  { %v539_v23 = vand.u32 4294901760, %v538_v21 }
  0xa5   :  { %v96_v24 = vand.u32 4294901760, %v95_v22 }
  0xa6   :  { %1001 = vmatmul.mubr.f32.vlgmr.msra.gmra.mrb[0].mxu1 %v539_v23 }
  0xa7   :  { %v97_v25 = vsub.f32 %v95_v22, %v96_v24  ;;  %1004 = vmatpush3.msra.mxu1 %v1081_v5  ;;  %1005 = vmatprep.mubr.msk.f32.mxu1 %vm1080_vm1, %v1081_v5 }
  0xa8   :  { %1008 = vmatprep.subr.mxu1 %v1081_v5 }
  0xa9   :  { %v98_v26 = vand.u32 4294901760, %v97_v25 }
  0xab   :  { %965 = vmatmul.mubr.f32.vlgmr.msra.gmra.mrb[0].mxu0 %v98_v26 }
  0xac   :  { %968 = vmatpush3.msra.mxu0 %v1081_v5  ;;  %969 = vmatprep.mubr.msk.f32.mxu0 %vm1080_vm1, %v1081_v5 }
  0xad   :  { %972 = vmatprep.subr.mxu0 %v1081_v5 }
  0xae   :  { %1006 = vmatmul.mubr.f32.vlgmr.msra.gmra.mrb[0].mxu1 %v535_v15 }
  0xaf   :  { %1009 = vmatpush3.msra.mxu1 %v1081_v5  ;;  %1010 = vmatprep.mubr.msk.f32.mxu1 %vm1080_vm1, %v1081_v5 }
  0xb0   :  { %1040 = vmatprep.subr.bf16.mxu1 %v1079_v4 }
  0xb3   :  { %970 = vmatmul.mubr.f32.vlgmr.msra.gmra.mrb[0].mxu0 %v94_v20 }
  0xb4   :  { %973 = vmatpush3.msra.mxu0 %v1081_v5  ;;  %974 = vmatprep.mubr.msk.f32.mxu0 %vm1080_vm1, %v1081_v5 }
  0xb5   :  { %1034 = vmatprep.subr.bf16.mxu0 %v1079_v4 }
  0xb6   :  { %1011 = vmatmul.mubr.f32.vlgmr.msra.gmra.mrb[0].mxu1 %v536_v16 }
  0xb7   :  { %1041 = vmatpush3.bf16.msra.mxu1 %v1082_v6  ;;  %1017 = vmatprep.mubr.msk.f32.mxu1 %vm1080_vm1, %v1081_v5 }
  0xb8   :  { %1020 = vmatprep.subr.mxu1 %v1081_v5 }
  0xbb   :  { %975 = vmatmul.mubr.f32.vlgmr.msra.gmra.mrb[0].mxu0 %v95_v22 }
  0xbc   :  { %1035 = vmatpush3.bf16.msra.mxu0 %v1082_v6  ;;  %981 = vmatprep.mubr.msk.f32.mxu0 %vm1080_vm1, %v1081_v5 }
  0xbd   :  { %984 = vmatprep.subr.mxu0 %v1081_v5 }
  0xbe   :  { %1018 = vmatmul.mubr.f32.vlgmr.msra.gmra.mrb[0].mxu1 %v537_v18 }
  0xbf   :  { %1021 = vmatpush3.msra.mxu1 %v1081_v5  ;;  %1022 = vmatprep.mubr.msk.f32.mxu1 %vm1080_vm1, %v1081_v5 }
  0xc0   :  { %1042 = vmatprep.subr.bf16.mxu1 %v1079_v4 }
  0xc3   :  { %982 = vmatmul.mubr.f32.vlgmr.msra.gmra.mrb[0].mxu0 %v96_v24 }
  0xc4   :  { %985 = vmatpush3.msra.mxu0 %v1081_v5  ;;  %986 = vmatprep.mubr.msk.f32.mxu0 %vm1080_vm1, %v1081_v5 }
  0xc5   :  { %1036 = vmatprep.subr.bf16.mxu0 %v1079_v4 }
  0xc6   :  { %1023 = vmatmul.mubr.f32.vlgmr.msra.gmra.mrb[0].mxu1 %v535_v15 }
  0xc7   :  { %1043 = vmatpush3.bf16.msra.mxu1 %v1082_v6  ;;  %1029 = vmatprep.mubr.msk.f32.mxu1 %vm1080_vm1, %v1081_v5 }
  0xcb   :  { %987 = vmatmul.mubr.f32.vlgmr.msra.gmra.mrb[0].mxu0 %v94_v20 }
  0xcc   :  { %1037 = vmatpush3.bf16.msra.mxu0 %v1082_v6  ;;  %993 = vmatprep.mubr.msk.f32.mxu0 %vm1080_vm1, %v1081_v5 }
  0xce   :  { %1030 = vmatmul.mubr.f32.vlgmr.msra.gmra.mrb[0].mxu1 %v535_v15 }
  0xd3   :  { %994 = vmatmul.mubr.f32.vlgmr.msra.gmra.mrb[0].mxu0 %v94_v20 }
 0x1a1   :  { %v899_v27 = vpop.f32.mrb[0].mxu1 }
 0x1a2   :  { %v1031_v28 = vpop.f32.mrb[1].mxu1  ;;  %v903_v32 = vsub.f32 %v899_v27, %v1120_v7 }
 0x1a6   :  { %v458_v29 = vpop.f32.mrb[0].mxu0 }
 0x1a7   :  { %1072 = vlog2.f32 %v458_v29  ;;  %v995_v30 = vpop.f32.mrb[1].mxu0 }
 0x1b1   :  { %v1073_v31 = vpop.eup %1072 }
 0x1b2   :  { %v905_v33 = vmul.f32 0.6931472, %v1073_v31 }
 0x1b4   :  { %v906_v34 = vsub.f32 %v903_v32, %v905_v33 }
 0x1b6   :  { %v908_v35 = vmul.f32 1.442695, %v906_v34  ;;  %v907_v43 = vsub.f32 0.0, %v906_v34 }
 0x1b8   :  { %1074 = vpow2.f32 %v908_v35 }
 0x1c2   :  { %v1075_v36 = vpop.eup %1074 }
 0x1c3   :  { %v910_v37 = vsub.f32 1.0, %v1075_v36 }
 0x1c5   :  { %v911_v39 = vmul.f32 2.0, %v910_v37 }
 0x1c7   :  { %v912_v40 = vmul.f32 %v911_v39, %v16_v38 }
 0x1c9   :  { %v913_v41 = vadd.f32 0.001, %v912_v40 }
 0x1cb   :  { %1076 = vrcp.f32 %v913_v41 }
 0x1d5   :  { %v1077_v42 = vpop.eup %1076 }
 0x1d6   :  { %v915_v44 = vmul.f32 10000.0, %v1077_v42 }
 0x1d8   :  { %v916_v45 = vmul.f32 %v915_v44, %v907_v43 }
 0x1da   :  { %925 = vst.msk [vmem:[%s1173_s3] sm:$0xff] %vm924_vm3, %v916_v45 }

</bundles_post_ra>
